<compile_context>
chip_gen: v5e
topology: v5e:2x2
jax: 0.10.0
libtpu: 0.0.40
codegen_flags: <defaults>
</compile_context>

<pallas_src>
import jax
import jax.numpy as jnp
import numpy as np
from jax.experimental import pallas as pl
from jax.experimental.pallas import tpu as pltpu


# --------------------------------------------------------------------------------------
# Kernels
# --------------------------------------------------------------------------------------
def _ffn_resident_kernel(x_ref, w1_ref, b1_ref, w2_ref, b2_ref, out_ref):
    """Weights fully VMEM-resident: one row tile per grid step, no reduction axis."""
    h = jnp.dot(x_ref[...].astype(jnp.bfloat16), w1_ref[...],
                preferred_element_type=jnp.float32)
    h = h + b1_ref[...]                              # bias in f32
    # dropout: identity (eval mode)
    y = jnp.dot(h.astype(jnp.bfloat16), w2_ref[...],
                preferred_element_type=jnp.float32)
    out_ref[...] = (y + b2_ref[...]).astype(out_ref.dtype)


def _ffn_reduce_kernel(x_ref, w1_ref, b1_ref, w2_ref, b2_ref, out_ref,
                       x_bf_ref, *scratch):
    """Streamed d_ff reduction.  If out dtype is f32 we accumulate directly into
    out_ref (its block index is constant across j, so it stays resident); otherwise an
    f32 VMEM scratch accumulator is passed in `scratch`."""
    acc_ref = scratch[0] if scratch else out_ref
    j = pl.program_id(1)

    @pl.when(j == 0)
    def _():
        # Cast the resident x row tile to bf16 once and reuse for every d_ff tile.
        x_bf_ref[...] = x_ref[...].astype(jnp.bfloat16)
        acc_ref[...] = jnp.zeros_like(acc_ref)

    # First linear: (tm, D) @ (D, tf) -> f32, bf16 operands on the MXU.
    h = jnp.dot(x_bf_ref[...], w1_ref[...], preferred_element_type=jnp.float32)
    h = h + b1_ref[...]
    # dropout: identity (eval mode)

    # Second linear (partial over this d_ff tile): accumulate in f32.
    acc_ref[...] += jnp.dot(h.astype(jnp.bfloat16), w2_ref[...],
                            preferred_element_type=jnp.float32)

    @pl.when(j == pl.num_programs(1) - 1)
    def _():
        out_ref[...] = (acc_ref[...] + b2_ref[...]).astype(out_ref.dtype)


# --------------------------------------------------------------------------------------
# Planning helpers
# --------------------------------------------------------------------------------------
def _round_up(x, m):
    return ((x + m - 1) // m) * m


def _vmem_capacity_bytes():
    try:
        info = pltpu.get_tpu_info()
        cap = getattr(info, "vmem_capacity_bytes", None)
        if cap:
            return int(cap)
    except Exception:
        pass
    return 64 * 1024 * 1024  # conservative fallback: v7x per-TensorCore VMEM


def _select_plan(M, D, d_ff, x_bytes, out_is_f32, vmem_cap, force_path=None):
    """Pick (path, tm, tf) from the VMEM budget.  Footprints budget 2 buffers per
    pipelined operand plus compiler temporaries for the (tm, *) intermediate."""
    budget = int(0.75 * vmem_cap)
    out_bytes = x_bytes

    def resident_fp(tm):
        return (2 * tm * D * x_bytes + 2 * tm * D * out_bytes
                + 2 * D * d_ff * 2 + 2 * d_ff * D * 2      # bf16 weights
                + 2 * d_ff * 4 + 2 * D * 4                 # f32 biases
                + tm * d_ff * 6)                           # h f32 + bf16 temporaries

    def reduce_fp(tm, tf):
        acc = 0 if out_is_f32 else tm * D * 4
        return (2 * tm * D * x_bytes + 2 * tm * D * out_bytes
                + 2 * D * tf * 2 + 2 * tf * D * 2
                + 2 * tf * 4 + 2 * D * 4
                + tm * D * 2                               # bf16 x scratch
                + acc + tm * tf * 6)

    if M <= 512:
        tm_cands = [max(8, _round_up(M, 8))]
    else:
        tm_cands = [512, 256, 128]

    if force_path != "reduce":
        for tm in tm_cands:
            if resident_fp(tm) <= budget:
                return {"path": "resident", "tm": tm, "tf": None, "fp": resident_fp(tm)}
        if force_path == "resident":
            tm = tm_cands[-1]
            return {"path": "resident", "tm": tm, "tf": None, "fp": resident_fp(tm)}

    d_ff_p = _round_up(d_ff, 128)
    tf = 512 if d_ff_p % 512 == 0 else (256 if d_ff_p % 256 == 0 else 128)
    for tm in tm_cands:
        if reduce_fp(tm, tf) <= budget:
            return {"path": "reduce", "tm": tm, "tf": tf, "fp": reduce_fp(tm, tf)}
    tm = tm_cands[-1]
    return {"path": "reduce", "tm": tm, "tf": tf, "fp": reduce_fp(tm, tf)}


# --------------------------------------------------------------------------------------
# Wrapper
# --------------------------------------------------------------------------------------
def positionwise_feedforward(x, w1, b1, w2, b2, *, force_path=None):
    """y = (x @ w1 + b1) @ w2 + b2, dropout = identity (eval)."""
    orig_shape = x.shape
    D = orig_shape[-1]
    d_ff = w1.shape[1]
    x2 = x.reshape(-1, D)
    M = x2.shape[0]

    # Hoisted weight casts: no-op if params are already stored in bf16.
    w1_bf = w1 if w1.dtype == jnp.bfloat16 else w1.astype(jnp.bfloat16)
    w2_bf = w2 if w2.dtype == jnp.bfloat16 else w2.astype(jnp.bfloat16)
    b1f = jnp.asarray(b1, jnp.float32).reshape(1, d_ff)
    b2f = jnp.asarray(b2, jnp.float32).reshape(1, D)

    out_dtype = x.dtype
    out_is_f32 = out_dtype == jnp.float32
    x_bytes = jnp.dtype(x.dtype).itemsize

    vmem_cap = _vmem_capacity_bytes()
    plan = _select_plan(M, D, d_ff, x_bytes, out_is_f32, vmem_cap, force_path)
    tm = plan["tm"]

    # Pad rows to a multiple of tm (sliced off after the kernel).
    M_pad = _round_up(M, tm)
    if M_pad != M:
        x2 = jnp.pad(x2, ((0, M_pad - M), (0, 0)))

    vmem_limit = int(min(0.92 * vmem_cap, max(32 * 1024 * 1024, 2 * plan["fp"])))

    if plan["path"] == "resident":
        out = pl.pallas_call(
            _ffn_resident_kernel,
            out_shape=jax.ShapeDtypeStruct((M_pad, D), out_dtype),
            grid_spec=pltpu.PrefetchScalarGridSpec(
                num_scalar_prefetch=0,
                grid=(M_pad // tm,),
                in_specs=[
                    pl.BlockSpec((tm, D), lambda i: (i, 0)),     # x rows
                    pl.BlockSpec((D, d_ff), lambda i: (0, 0)),   # W1 (resident, bf16)
                    pl.BlockSpec((1, d_ff), lambda i: (0, 0)),   # b1 (f32)
                    pl.BlockSpec((d_ff, D), lambda i: (0, 0)),   # W2 (resident, bf16)
                    pl.BlockSpec((1, D), lambda i: (0, 0)),      # b2 (f32)
                ],
                out_specs=pl.BlockSpec((tm, D), lambda i: (i, 0)),
            ),
            compiler_params=pltpu.CompilerParams(
                dimension_semantics=("parallel",),
                vmem_limit_bytes=vmem_limit),
        )(x2, w1_bf, b1f, w2_bf, b2f)
    else:
        tf = plan["tf"]
        # Pad d_ff with zeros (exact: padded hidden cols hit zero rows of W2).
        d_ff_p = _round_up(d_ff, 128)
        if d_ff_p != d_ff:
            w1_bf = jnp.pad(w1_bf, ((0, 0), (0, d_ff_p - d_ff)))
            b1f = jnp.pad(b1f, ((0, 0), (0, d_ff_p - d_ff)))
            w2_bf = jnp.pad(w2_bf, ((0, d_ff_p - d_ff), (0, 0)))

        scratch = [pltpu.VMEM((tm, D), jnp.bfloat16)]        # cached bf16 x tile
        if not out_is_f32:
            scratch.append(pltpu.VMEM((tm, D), jnp.float32))  # f32 accumulator

        out = pl.pallas_call(
            _ffn_reduce_kernel,
            out_shape=jax.ShapeDtypeStruct((M_pad, D), out_dtype),
            grid_spec=pltpu.PrefetchScalarGridSpec(
                num_scalar_prefetch=0,
                grid=(M_pad // tm, d_ff_p // tf),
                in_specs=[
                    pl.BlockSpec((tm, D), lambda i, j: (i, 0)),   # x rows
                    pl.BlockSpec((D, tf), lambda i, j: (0, j)),   # W1 tile (bf16)
                    pl.BlockSpec((1, tf), lambda i, j: (0, j)),   # b1 tile (f32)
                    pl.BlockSpec((tf, D), lambda i, j: (j, 0)),   # W2 tile (bf16)
                    pl.BlockSpec((1, D), lambda i, j: (0, 0)),    # b2      (f32)
                ],
                out_specs=pl.BlockSpec((tm, D), lambda i, j: (i, 0)),
                scratch_shapes=scratch,
            ),
            compiler_params=pltpu.CompilerParams(
                dimension_semantics=("parallel", "arbitrary"),
                vmem_limit_bytes=vmem_limit),
        )(x2, w1_bf, b1f, w2_bf, b2f)

    if M_pad != M:
        out = out[:M]
    return out.reshape(orig_shape)


def positionwise_feedforward_ref(x, w1, b1, w2, b2):
    """Pure-JAX f32 reference (dropout identity)."""
    return (x @ w1 + b1) @ w2 + b2


# --------------------------------------------------------------------------------------
# Test
# --------------------------------------------------------------------------------------
if __name__ == "__main__":
    B, S, D, DFF = 2, 8, 32, 64   # batch, seq, d_model, d_ff

    key = jax.random.PRNGKey(0)
    ks = jax.random.split(key, 5)
    w1 = 0.1 * jax.random.normal(ks[0], (D, DFF), jnp.float32)
    b1 = 0.01 * jax.random.normal(ks[1], (1, DFF), jnp.float32)
    w2 = 0.1 * jax.random.normal(ks[2], (DFF, D), jnp.float32)
    b2 = 0.01 * jax.random.normal(ks[3], (1, D), jnp.float32)
    x = jax.random.normal(ks[4], (B, S, D), jnp.float32)

    # Cast params to bf16 once, outside the per-call wrapper (hoisted weight cast).
    w1_bf = w1.astype(jnp.bfloat16)
    w2_bf = w2.astype(jnp.bfloat16)

    ref = positionwise_feedforward_ref(x, w1, b1, w2, b2)

    # Path 1 (default for these shapes): weights fully VMEM-resident.
    out = jax.block_until_ready(positionwise_feedforward(x, w1_bf, b1, w2_bf, b2))
    np.testing.assert_allclose(np.asarray(out), np.asarray(ref), rtol=3e-2, atol=3e-2)

    # Path 2: streamed d_ff reduction (exercises padding + accumulate-into-out).
    out2 = jax.block_until_ready(
        positionwise_feedforward(x, w1_bf, b1, w2_bf, b2, force_path="reduce"))
    np.testing.assert_allclose(np.asarray(out2), np.asarray(ref), rtol=3e-2, atol=3e-2)

    print("KERNEL_OK")
</pallas_src>

<mosaic_0001>
module attributes {stable_mosaic.version = 11 : i64} {
  func.func @_ffn_resident_kernel(%arg0: i32, %arg1: memref<16x32xf32, #tpu.memory_space<vmem>>, %arg2: memref<32x64xbf16, #tpu.memory_space<vmem>>, %arg3: memref<1x64xf32, #tpu.memory_space<vmem>>, %arg4: memref<64x32xbf16, #tpu.memory_space<vmem>>, %arg5: memref<1x32xf32, #tpu.memory_space<vmem>>, %arg6: memref<16x32xf32, #tpu.memory_space<vmem>>) attributes {dimension_semantics = [#tpu.dimension_semantics<parallel>], iteration_bounds = array<i64: 1>, scalar_prefetch = 0 : i64, scratch_operands = 0 : i64, tpu.core_type = #tpu.core_type<tc>, window_params = [{transform_indices = @transform_0, window_bounds = array<i64: 16, 32>}, {pipeline_mode = #tpu.pipeline_mode<synchronous>, transform_indices = @transform_1, window_bounds = array<i64: 32, 64>}, {pipeline_mode = #tpu.pipeline_mode<synchronous>, transform_indices = @transform_2, window_bounds = array<i64: 1, 64>}, {pipeline_mode = #tpu.pipeline_mode<synchronous>, transform_indices = @transform_3, window_bounds = array<i64: 64, 32>}, {pipeline_mode = #tpu.pipeline_mode<synchronous>, transform_indices = @transform_4, window_bounds = array<i64: 1, 32>}, {transform_indices = @transform_5, window_bounds = array<i64: 16, 32>}]} {
    %c0 = arith.constant 0 : index
    %c0_0 = arith.constant 0 : index
    %0 = vector.load %arg1[%c0, %c0_0] : memref<16x32xf32, #tpu.memory_space<vmem>>, vector<16x32xf32>
    %1 = arith.truncf %0 : vector<16x32xf32> to vector<16x32xbf16>
    %c0_1 = arith.constant 0 : index
    %c0_2 = arith.constant 0 : index
    %2 = vector.load %arg2[%c0_1, %c0_2] : memref<32x64xbf16, #tpu.memory_space<vmem>>, vector<32x64xbf16>
    %cst = arith.constant dense<0.000000e+00> : vector<16x64xf32>
    %3 = tpu.matmul %1, %2, %cst {dimension_numbers = #tpu.dot_dimension_numbers<[1], [0], [0], [1], [0, 0, 1, 1], [], []>} : vector<16x32xbf16>, vector<32x64xbf16>, vector<16x64xf32> -> vector<16x64xf32>
    %c0_3 = arith.constant 0 : index
    %c0_4 = arith.constant 0 : index
    %4 = vector.load %arg3[%c0_3, %c0_4] : memref<1x64xf32, #tpu.memory_space<vmem>>, vector<1x64xf32>
    %5 = vector.broadcast %4 : vector<1x64xf32> to vector<16x64xf32>
    %6 = arith.addf %3, %5 : vector<16x64xf32>
    %7 = arith.truncf %6 : vector<16x64xf32> to vector<16x64xbf16>
    %c0_5 = arith.constant 0 : index
    %c0_6 = arith.constant 0 : index
    %8 = vector.load %arg4[%c0_5, %c0_6] : memref<64x32xbf16, #tpu.memory_space<vmem>>, vector<64x32xbf16>
    %cst_7 = arith.constant dense<0.000000e+00> : vector<16x32xf32>
    %9 = tpu.matmul %7, %8, %cst_7 {dimension_numbers = #tpu.dot_dimension_numbers<[1], [0], [0], [1], [0, 0, 1, 1], [], []>} : vector<16x64xbf16>, vector<64x32xbf16>, vector<16x32xf32> -> vector<16x32xf32>
    %c0_8 = arith.constant 0 : index
    %c0_9 = arith.constant 0 : index
    %10 = vector.load %arg5[%c0_8, %c0_9] : memref<1x32xf32, #tpu.memory_space<vmem>>, vector<1x32xf32>
    %11 = vector.broadcast %10 : vector<1x32xf32> to vector<16x32xf32>
    %12 = arith.addf %9, %11 : vector<16x32xf32>
    %c0_10 = arith.constant 0 : index
    %c0_11 = arith.constant 0 : index
    %13 = vector.load %arg6[%c0_10, %c0_11] : memref<16x32xf32, #tpu.memory_space<vmem>>, vector<16x32xf32>
    tpu.vector_store %arg6[%c0_10, %c0_11], %12 {strides = array<i32>} : memref<16x32xf32, #tpu.memory_space<vmem>>, vector<16x32xf32>,
    return
  }
  func.func @transform_0(%arg0: i32) -> (i32, i32) {
    %c0_i32 = arith.constant 0 : i32
    %c0_i32_0 = arith.constant 0 : i32
    return %arg0, %c0_i32 : i32, i32
  }
  func.func @transform_1(%arg0: i32) -> (i32, i32) {
    %c0_i32 = arith.constant 0 : i32
    %c0_i32_0 = arith.constant 0 : i32
    %c0_i32_1 = arith.constant 0 : i32
    return %c0_i32, %c0_i32_0 : i32, i32
  }
  func.func @transform_2(%arg0: i32) -> (i32, i32) {
    %c0_i32 = arith.constant 0 : i32
    %c0_i32_0 = arith.constant 0 : i32
    %c0_i32_1 = arith.constant 0 : i32
    return %c0_i32, %c0_i32_0 : i32, i32
  }
  func.func @transform_3(%arg0: i32) -> (i32, i32) {
    %c0_i32 = arith.constant 0 : i32
    %c0_i32_0 = arith.constant 0 : i32
    %c0_i32_1 = arith.constant 0 : i32
    return %c0_i32, %c0_i32_0 : i32, i32
  }
  func.func @transform_4(%arg0: i32) -> (i32, i32) {
    %c0_i32 = arith.constant 0 : i32
    %c0_i32_0 = arith.constant 0 : i32
    %c0_i32_1 = arith.constant 0 : i32
    return %c0_i32, %c0_i32_0 : i32, i32
  }
  func.func @transform_5(%arg0: i32) -> (i32, i32) {
    %c0_i32 = arith.constant 0 : i32
    %c0_i32_0 = arith.constant 0 : i32
    return %arg0, %c0_i32 : i32, i32
  }
}

</mosaic_0001>

<bundles_post_ra>
// kernel: tpu_custom_call.1
= control target key start
LH: loop header
LB: loop body
LE: loop exit
PB: predicated region body
PF: predicated region fallthrough
CT: control target
= control target key end

     0   :  { %s270_s0 = inlined_call_operand.vmem [shape: f32[16,32], index: 0, kind: input, shape index: {}]   ;;  %s271_s1 = inlined_call_operand.vmem [shape: bf16[32,64], index: 1, kind: input, shape index: {}]   ;;  %s272_s2 = inlined_call_operand.vmem [shape: f32[1,64], index: 2, kind: input, shape index: {}]   ;;  %s273_s3 = inlined_call_operand.vmem [shape: bf16[64,32], index: 3, kind: input, shape index: {}]   ;;  %s274_s4 = inlined_call_operand.vmem [shape: f32[1,32], index: 4, kind: input, shape index: {}]   ;;  %s275_s5 = inlined_call_operand.hbm [shape: f32[16,32], index: 5, kind: output, shape index: {}]  }
   0x1   :  { %v165_v0 = vld [vmem:[%s271_s1 + $0x8] sm:$0xff]  ;;  %v164_v1 = vld [vmem:[%s271_s1] sm:$0xff]  ;;  %v169_v3 = vld [vmem:[%s273_s3 + $0x18] sm:$0xff] }
   0x2   :  { %v22_v2 = vld [vmem:[%s270_s0] sm:$0xff]  ;;  %55 = vmatpush.bf16.msra.mxu0 %v165_v0  ;;  %v23_v4 = vld [vmem:[%s270_s0 + $0x8] sm:$0xff] }
   0x3   :  { %10 = vsyncpa [#allocation3], 0  ;;  %108 = vmatpush.bf16.msra.mxu1 %v169_v3  ;;  %v24_v5 = vpack.c.bf16 %v23_v4, %v22_v2  ;;  %vm45_vm0 = vcmask 261120   ;;  %v168_v6 = vld [vmem:[%s273_s3 + $0x10] sm:$0xff]  ;;  %v167_v7 = vld [vmem:[%s273_s3 + $0x8] sm:$0xff]  ;;  %vm100_vm1 = vcmask 523264  }
   0x4   :  { %v166_v8 = vld [vmem:[%s273_s3] sm:$0xff]  ;;  %s201_s3 = smov [#allocation2]   ;;  %s202_s14 = smov 128  }
   0x5   :  { %v173_v10 = vld [vmem:[%s272_s2] ss:$0 sm:$0xff]  ;;  %s124_s11 = sshll.u32 %s201_s3, 4  ;;  %s126_s2 = sshll.u32 %s275_s5, 4  ;;  %s125_s11 = int_to_ptr.vmem [resolvable:$true] %s124_s11  ;;  %s127_s2 = int_to_ptr.hbm [resolvable:$true] %s126_s2 }
   0x6   :  { %56 = vmatpush.bf16.msra.mxu0 %v164_v1  ;;  %v174_v15 = vld [vmem:[%s274_s4] ss:$0 sm:$0xff]  ;;  %s203_s15 = smov 8  }
   0x7   :  { %109 = vmatpush.bf16.msra.mxu1 %v168_v6 }
   0x9   :  { %146 = vmatmul.msk.bf16.vlgmr.msra.gmra.mxu0 %vm45_vm0, %v24_v5 }
   0xb   :  { %110 = vmatpush.bf16.msra.mxu1 %v167_v7 }
   0xf   :  { %111 = vmatpush.bf16.msra.mxu1 %v166_v8 }
  0x86   :  { %v58_v9 = vpop.f32.mrf.mxu0 }
  0x87   :  { %v59_v12 = vadd.f32 %v173_v10, %v58_v9 }
  0x8e   :  { %v60_v11 = vpop.f32.mrf.mxu0 }
  0x8f   :  { %v61_v13 = vadd.f32 %v173_v10, %v60_v11 }
  0x91   :  { %v63_v14 = vpack.c.bf16 %v61_v13, %v59_v12 }
  0x93   :  { %163 = vmatmul.msk.bf16.vlgmr.msra.gmra.mxu1 %vm100_vm1, %v63_v14 }
 0x110   :  { %v113_v16 = vpop.f32.mrf.mxu1 }
 0x111   :  { %v114_v17 = vadd.f32 %v174_v15, %v113_v16 }
 0x113   :  { %118 = vst.msk [vmem:[#allocation2] sm:$0xff] %vm45_vm0, %v114_v17 }
 0x118   :  { %v115_v18 = vpop.f32.mrf.mxu1 }
 0x119   :  { %v116_v19 = vadd.f32 %v174_v15, %v115_v18 }
 0x11b   :  { %119 = vst.msk [vmem:[#allocation2 + $0x8] sm:$0xff] %vm45_vm0, %v116_v19 }
 0x11c   :  { %132 = dma.vmem_to_hbm [thread:$0]  %s125_s11, 256, %s127_s2, [#allocation3], %s202_s14, %s202_s14, %s203_s15  }
 0x11d   :  { %199 = dma.done.wait [#allocation3], 256  }
 0x11e   :  { %200 = vsyncadd [#allocation3], 4294967040 }
 0x11f   :  { %137 = vsyncpa [#allocation3], 1 }

</bundles_post_ra>
